<compile_context>
chip_gen: v5e
topology: v5e:2x2
jax: 0.10.0
libtpu: 0.0.40
codegen_flags: <defaults>
</compile_context>

<pallas_src>
import jax
import jax.numpy as jnp
from jax.experimental import pallas as pl
from jax.experimental.pallas import tpu as pltpu


def _round_up(x, m):
    return ((x + m - 1) // m) * m


# --------------------------------- kernels ----------------------------------


def _mlp_kernel_row_out(x_ref, w1_ref, b1_ref, w2_ref, b2_ref, w3_ref, b3_ref,
                        o_ref):
    """Preferred layout: per-tile result as a lane-dense (1, tb) row."""
    # fc1: Linear(F -> H) + ReLU.  f32 tile cast to bf16 on the VPU, MXU matmul
    # with f32 accumulation; bias + ReLU stay f32 on the VPU.
    h1 = jnp.dot(x_ref[...].astype(jnp.bfloat16), w1_ref[...],
                 preferred_element_type=jnp.float32)
    h1 = jnp.maximum(h1 + b1_ref[...], 0.0)
    # fc2: Linear(H -> H) + ReLU.
    h2 = jnp.dot(h1.astype(jnp.bfloat16), w2_ref[...],
                 preferred_element_type=jnp.float32)
    h2 = jnp.maximum(h2 + b2_ref[...], 0.0)
    # fc3: Linear(H -> 1).  VPU multiply + XLU lane reduction keeps the N=1
    # matmul off the MXU; the [tb,1]->[1,tb] transpose runs on the XLU slot.
    col = jnp.sum(h2 * w3_ref[...], axis=-1, keepdims=True) + b3_ref[...]
    o_ref[...] = jnp.transpose(col).astype(o_ref.dtype)


def _mlp_kernel_col_out(x_ref, w1_ref, b1_ref, w2_ref, b2_ref, w3_ref, b3_ref,
                        o_ref):
    """Fallback layout: per-tile result as a (tb, 1) column (proven to lower)."""
    h1 = jnp.dot(x_ref[...].astype(jnp.bfloat16), w1_ref[...],
                 preferred_element_type=jnp.float32)
    h1 = jnp.maximum(h1 + b1_ref[...], 0.0)
    h2 = jnp.dot(h1.astype(jnp.bfloat16), w2_ref[...],
                 preferred_element_type=jnp.float32)
    h2 = jnp.maximum(h2 + b2_ref[...], 0.0)
    out = jnp.sum(h2 * w3_ref[...], axis=-1, keepdims=True) + b3_ref[...]
    o_ref[...] = out.astype(o_ref.dtype)


# --------------------------------- wrapper ----------------------------------


def _const_spec(shape, single_buffer):
    """BlockSpec for a VMEM-resident operand (constant index_map)."""
    if single_buffer:
        # Constant blocks need no double-buffering; halves their VMEM footprint
        # (matters on v7x's 64 MiB/TC once F/H get large).
        return pl.BlockSpec(shape, lambda i: (0, 0), pipeline_mode=pl.Buffered(1))
    return pl.BlockSpec(shape, lambda i: (0, 0))


def _call_mlp(x_pad, w1_bf, b1, w2_bf, b2, w3_row, b3, *, tb, lane_dense,
              single_buffer_weights):
    b_pad, F = x_pad.shape
    H = w1_bf.shape[1]
    n_steps = b_pad // tb

    if lane_dense:
        kernel = _mlp_kernel_row_out
        out_shape = jax.ShapeDtypeStruct((n_steps, tb), jnp.float32)
        out_spec = pl.BlockSpec((1, tb), lambda i: (i, 0))
    else:
        kernel = _mlp_kernel_col_out
        out_shape = jax.ShapeDtypeStruct((b_pad, 1), jnp.float32)
        out_spec = pl.BlockSpec((tb, 1), lambda i: (i, 0))

    # VMEM budget from actual buffer sizes + headroom for Mosaic scratch; never
    # ask for more than 56 MiB so v7x (64 MiB/TC) keeps compiler headroom.
    weight_bufs = 1 if single_buffer_weights else 2
    est_bytes = (
        2 * tb * F * 4                        # x tile, double-buffered, f32
        + weight_bufs * (F * H + H * H) * 2   # w1, w2 (bf16, VMEM-resident)
        + weight_bufs * 4 * H * 4             # b1, b2, w3 row, b3 (f32)
        + 2 * tb * 4                          # output tile, double-buffered
        + 3 * tb * H * 4                      # h1 / h2 / temporaries (f32)
    )
    vmem_limit = int(min(max(est_bytes + (8 << 20), 32 << 20), 56 << 20))

    flops = 2 * b_pad * (F * H + H * H + H)
    bytes_accessed = b_pad * F * 4 + (F * H + H * H) * 2 + 4 * H * 4 + b_pad * 4

    out = pl.pallas_call(
        kernel,
        out_shape=out_shape,
        grid_spec=pltpu.PrefetchScalarGridSpec(
            num_scalar_prefetch=0,
            grid=(n_steps,),
            in_specs=[
                # x tile slides along the batch; everything else stays resident.
                pl.BlockSpec((tb, F), lambda i: (i, 0)),
                _const_spec((F, H), single_buffer_weights),
                _const_spec((1, H), single_buffer_weights),
                _const_spec((H, H), single_buffer_weights),
                _const_spec((1, H), single_buffer_weights),
                _const_spec((1, H), single_buffer_weights),
                _const_spec((1, 1), single_buffer_weights),
            ],
            out_specs=out_spec,
        ),
        compiler_params=pltpu.CompilerParams(
            # Batch steps are independent -> parallel (2 TCs on v7x).
            dimension_semantics=("parallel",),
            vmem_limit_bytes=vmem_limit,
        ),
        cost_estimate=pl.CostEstimate(
            flops=flops, transcendentals=0, bytes_accessed=bytes_accessed),
    )(x_pad, w1_bf, b1, w2_bf, b2, w3_row, b3)

    if lane_dense:
        out = out.reshape(b_pad, 1)
    return out


def mlp_forward(x, params, *, block_batch=None):
    """x: [B, F] float32. params: w1,b1,w2,b2,w3,b3 (w_k: [in,out], b_k: [1,out])."""
    w1, b1, w2, b2, w3, b3 = (params[k] for k in ("w1", "b1", "w2", "b2", "w3", "b3"))
    B, F = x.shape
    H = w1.shape[1]

    if block_batch is None:
        # Large tiles fill the MXU M-dim (256-wide on v6e/v7x) and amortize the
        # per-grid-step overhead; go bigger when the batch allows.
        block_batch = 512 if B >= 4096 else 256

    # Batch tile: multiple of 16 (bf16 sublane packing), no bigger than the
    # (padded) batch.
    tb = max(16, min(_round_up(block_batch, 16), _round_up(B, 16)))
    b_pad = _round_up(B, tb)
    # v7x has two TensorCores: keep >= 2 grid steps so the "parallel" batch
    # axis can be split across them (no effect on single-TC v5e/v6e).
    if b_pad // tb < 2 and tb > 16:
        tb = max(16, _round_up(tb // 2, 16))
        b_pad = _round_up(B, tb)

    if b_pad != B:
        x = jnp.pad(x, ((0, b_pad - B), (0, 0)))

    # Weights are tiny and reused every grid step -> cast to bf16 once in the
    # wrapper.  x is NOT cast here (that would add a full extra HBM pass over
    # the batch); the kernel casts each tile on the VPU instead.
    w1_bf = w1.astype(jnp.bfloat16)
    w2_bf = w2.astype(jnp.bfloat16)
    w3_row = jnp.reshape(w3, (1, H)).astype(jnp.float32)   # [H,1] -> [1,H]

    # Preferred configuration first; fall back if this jax/Mosaic build rejects
    # single-buffered constant blocks or the lane-dense (1, tb) output store.
    configs = (
        dict(lane_dense=True, single_buffer_weights=True),
        dict(lane_dense=True, single_buffer_weights=False),
        dict(lane_dense=False, single_buffer_weights=False),
    )
    last_err = None
    for cfg in configs:
        try:
            out = _call_mlp(x, w1_bf, b1, w2_bf, b2, w3_row, b3, tb=tb, **cfg)
            return out[:B]
        except Exception as e:  # fall back to a more conservative layout
            last_err = e
    raise last_err


# ------------------------------ init / reference -----------------------------


def init_params(key, in_features, hidden_size):
    """PyTorch-Linear-style (Kaiming-uniform-ish) init, weights stored [in, out]."""
    def linear_init(k, fan_in, fan_out):
        kw, kb = jax.random.split(k)
        bound = 1.0 / jnp.sqrt(jnp.float32(fan_in))
        w = jax.random.uniform(kw, (fan_in, fan_out), jnp.float32, -bound, bound)
        b = jax.random.uniform(kb, (1, fan_out), jnp.float32, -bound, bound)
        return w, b

    k1, k2, k3 = jax.random.split(key, 3)
    w1, b1 = linear_init(k1, in_features, hidden_size)
    w2, b2 = linear_init(k2, hidden_size, hidden_size)
    w3, b3 = linear_init(k3, hidden_size, 1)
    return {"w1": w1, "b1": b1, "w2": w2, "b2": b2, "w3": w3, "b3": b3}


def mlp_reference(x, p):
    # Reference uses the same bf16-input / f32-accumulate numerics as the kernel.
    h1 = jnp.dot(x.astype(jnp.bfloat16), p["w1"].astype(jnp.bfloat16),
                 preferred_element_type=jnp.float32)
    h1 = jnp.maximum(h1 + p["b1"], 0.0)
    h2 = jnp.dot(h1.astype(jnp.bfloat16), p["w2"].astype(jnp.bfloat16),
                 preferred_element_type=jnp.float32)
    h2 = jnp.maximum(h2 + p["b2"], 0.0)
    return jnp.sum(h2 * p["w3"].T, axis=-1, keepdims=True) + p["b3"]


if __name__ == "__main__":
    key = jax.random.PRNGKey(0)
    k_x, k_p = jax.random.split(key)

    # Small but TPU-tile-aligned demo sizes.  batch=256 -> tile is auto-split to
    # 128 rows x 2 grid steps (>= 2 steps for v7x's two TensorCores).
    batch, in_features, hidden = 256, 128, 128
    x = jax.random.normal(k_x, (batch, in_features), jnp.float32)
    params = init_params(k_p, in_features, hidden)

    out = mlp_forward(x, params)
    out = jax.block_until_ready(out)

    ref = mlp_reference(x, params)
    assert out.shape == (batch, 1), out.shape
    assert jnp.allclose(out, ref, atol=1e-3, rtol=1e-3), (
        f"max abs diff {jnp.max(jnp.abs(out - ref))}"
    )
    print("KERNEL_OK")
</pallas_src>

<mosaic_0001>
module attributes {stable_mosaic.version = 11 : i64} {
  func.func @_mlp_kernel_col_out(%arg0: i32, %arg1: memref<128x128xf32, #tpu.memory_space<vmem>>, %arg2: memref<128x128xbf16, #tpu.memory_space<vmem>>, %arg3: memref<1x128xf32, #tpu.memory_space<vmem>>, %arg4: memref<128x128xbf16, #tpu.memory_space<vmem>>, %arg5: memref<1x128xf32, #tpu.memory_space<vmem>>, %arg6: memref<1x128xf32, #tpu.memory_space<vmem>>, %arg7: memref<1x1xf32, #tpu.memory_space<vmem>>, %arg8: memref<128x1xf32, #tpu.memory_space<vmem>>) attributes {dimension_semantics = [#tpu.dimension_semantics<parallel>], iteration_bounds = array<i64: 2>, scalar_prefetch = 0 : i64, scratch_operands = 0 : i64, tpu.core_type = #tpu.core_type<tc>, window_params = [{transform_indices = @transform_0, window_bounds = array<i64: 128, 128>}, {pipeline_mode = #tpu.pipeline_mode<synchronous>, transform_indices = @transform_1, window_bounds = array<i64: 128, 128>}, {pipeline_mode = #tpu.pipeline_mode<synchronous>, transform_indices = @transform_2, window_bounds = array<i64: 1, 128>}, {pipeline_mode = #tpu.pipeline_mode<synchronous>, transform_indices = @transform_3, window_bounds = array<i64: 128, 128>}, {pipeline_mode = #tpu.pipeline_mode<synchronous>, transform_indices = @transform_4, window_bounds = array<i64: 1, 128>}, {pipeline_mode = #tpu.pipeline_mode<synchronous>, transform_indices = @transform_5, window_bounds = array<i64: 1, 128>}, {pipeline_mode = #tpu.pipeline_mode<synchronous>, transform_indices = @transform_6, window_bounds = array<i64: 1, 1>}, {transform_indices = @transform_7, window_bounds = array<i64: 128, 1>}]} {
    %c0 = arith.constant 0 : index
    %c0_0 = arith.constant 0 : index
    %0 = vector.load %arg1[%c0, %c0_0] : memref<128x128xf32, #tpu.memory_space<vmem>>, vector<128x128xf32>
    %1 = arith.truncf %0 : vector<128x128xf32> to vector<128x128xbf16>
    %c0_1 = arith.constant 0 : index
    %c0_2 = arith.constant 0 : index
    %2 = vector.load %arg2[%c0_1, %c0_2] : memref<128x128xbf16, #tpu.memory_space<vmem>>, vector<128x128xbf16>
    %cst = arith.constant dense<0.000000e+00> : vector<128x128xf32>
    %3 = tpu.matmul %1, %2, %cst {dimension_numbers = #tpu.dot_dimension_numbers<[1], [0], [0], [1], [0, 0, 1, 1], [], []>} : vector<128x128xbf16>, vector<128x128xbf16>, vector<128x128xf32> -> vector<128x128xf32>
    %c0_3 = arith.constant 0 : index
    %c0_4 = arith.constant 0 : index
    %4 = vector.load %arg3[%c0_3, %c0_4] : memref<1x128xf32, #tpu.memory_space<vmem>>, vector<1x128xf32>
    %5 = vector.broadcast %4 : vector<1x128xf32> to vector<128x128xf32>
    %6 = arith.addf %3, %5 : vector<128x128xf32>
    %cst_5 = arith.constant 0.000000e+00 : f32
    %7 = vector.broadcast %cst_5 : f32 to vector<128x128xf32>
    %8 = arith.maximumf %6, %7 : vector<128x128xf32>
    %9 = arith.truncf %8 : vector<128x128xf32> to vector<128x128xbf16>
    %c0_6 = arith.constant 0 : index
    %c0_7 = arith.constant 0 : index
    %10 = vector.load %arg4[%c0_6, %c0_7] : memref<128x128xbf16, #tpu.memory_space<vmem>>, vector<128x128xbf16>
    %cst_8 = arith.constant dense<0.000000e+00> : vector<128x128xf32>
    %11 = tpu.matmul %9, %10, %cst_8 {dimension_numbers = #tpu.dot_dimension_numbers<[1], [0], [0], [1], [0, 0, 1, 1], [], []>} : vector<128x128xbf16>, vector<128x128xbf16>, vector<128x128xf32> -> vector<128x128xf32>
    %c0_9 = arith.constant 0 : index
    %c0_10 = arith.constant 0 : index
    %12 = vector.load %arg5[%c0_9, %c0_10] : memref<1x128xf32, #tpu.memory_space<vmem>>, vector<1x128xf32>
    %13 = vector.broadcast %12 : vector<1x128xf32> to vector<128x128xf32>
    %14 = arith.addf %11, %13 : vector<128x128xf32>
    %cst_11 = arith.constant 0.000000e+00 : f32
    %15 = vector.broadcast %cst_11 : f32 to vector<128x128xf32>
    %16 = arith.maximumf %14, %15 : vector<128x128xf32>
    %c0_12 = arith.constant 0 : index
    %c0_13 = arith.constant 0 : index
    %17 = vector.load %arg6[%c0_12, %c0_13] : memref<1x128xf32, #tpu.memory_space<vmem>>, vector<1x128xf32>
    %18 = vector.broadcast %17 : vector<1x128xf32> to vector<128x128xf32>
    %19 = arith.mulf %16, %18 : vector<128x128xf32>
    %cst_14 = arith.constant dense<0.000000e+00> : vector<128xf32>
    %20 = vector.multi_reduction <add>, %19, %cst_14 [1] : vector<128x128xf32> to vector<128xf32>
    %21 = vector.shape_cast %20 : vector<128xf32> to vector<128x1xf32>
    %c0_15 = arith.constant 0 : index
    %c0_16 = arith.constant 0 : index
    %22 = vector.load %arg7[%c0_15, %c0_16] : memref<1x1xf32, #tpu.memory_space<vmem>>, vector<1x1xf32>
    %23 = vector.broadcast %22 : vector<1x1xf32> to vector<128x1xf32>
    %24 = arith.addf %21, %23 : vector<128x1xf32>
    %c0_17 = arith.constant 0 : index
    %c0_18 = arith.constant 0 : index
    %25 = vector.load %arg8[%c0_17, %c0_18] : memref<128x1xf32, #tpu.memory_space<vmem>>, vector<128x1xf32>
    tpu.vector_store %arg8[%c0_17, %c0_18], %24 {strides = array<i32>} : memref<128x1xf32, #tpu.memory_space<vmem>>, vector<128x1xf32>,
    return
  }
  func.func @transform_0(%arg0: i32) -> (i32, i32) {
    %c0_i32 = arith.constant 0 : i32
    %c0_i32_0 = arith.constant 0 : i32
    return %arg0, %c0_i32 : i32, i32
  }
  func.func @transform_1(%arg0: i32) -> (i32, i32) {
    %c0_i32 = arith.constant 0 : i32
    %c0_i32_0 = arith.constant 0 : i32
    %c0_i32_1 = arith.constant 0 : i32
    return %c0_i32, %c0_i32_0 : i32, i32
  }
  func.func @transform_2(%arg0: i32) -> (i32, i32) {
    %c0_i32 = arith.constant 0 : i32
    %c0_i32_0 = arith.constant 0 : i32
    %c0_i32_1 = arith.constant 0 : i32
    return %c0_i32, %c0_i32_0 : i32, i32
  }
  func.func @transform_3(%arg0: i32) -> (i32, i32) {
    %c0_i32 = arith.constant 0 : i32
    %c0_i32_0 = arith.constant 0 : i32
    %c0_i32_1 = arith.constant 0 : i32
    return %c0_i32, %c0_i32_0 : i32, i32
  }
  func.func @transform_4(%arg0: i32) -> (i32, i32) {
    %c0_i32 = arith.constant 0 : i32
    %c0_i32_0 = arith.constant 0 : i32
    %c0_i32_1 = arith.constant 0 : i32
    return %c0_i32, %c0_i32_0 : i32, i32
  }
  func.func @transform_5(%arg0: i32) -> (i32, i32) {
    %c0_i32 = arith.constant 0 : i32
    %c0_i32_0 = arith.constant 0 : i32
    %c0_i32_1 = arith.constant 0 : i32
    return %c0_i32, %c0_i32_0 : i32, i32
  }
  func.func @transform_6(%arg0: i32) -> (i32, i32) {
    %c0_i32 = arith.constant 0 : i32
    %c0_i32_0 = arith.constant 0 : i32
    %c0_i32_1 = arith.constant 0 : i32
    return %c0_i32, %c0_i32_0 : i32, i32
  }
  func.func @transform_7(%arg0: i32) -> (i32, i32) {
    %c0_i32 = arith.constant 0 : i32
    %c0_i32_0 = arith.constant 0 : i32
    return %arg0, %c0_i32 : i32, i32
  }
}

</mosaic_0001>

<bundles_post_ra>
// kernel: tpu_custom_call.1
= control target key start
LH: loop header
LB: loop body
LE: loop exit
PB: predicated region body
PF: predicated region fallthrough
CT: control target
= control target key end

     0   :  { %s1378_s0 = inlined_call_operand.hbm [shape: f32[256,128], index: 0, kind: input, shape index: {}]   ;;  %s1379_s1 = inlined_call_operand.hbm [shape: bf16[128,128], index: 1, kind: input, shape index: {}]   ;;  %s1380_s2 = inlined_call_operand.vmem [shape: f32[1,128], index: 2, kind: input, shape index: {}]   ;;  %s1381_s3 = inlined_call_operand.hbm [shape: bf16[128,128], index: 3, kind: input, shape index: {}]   ;;  %s1382_s4 = inlined_call_operand.vmem [shape: f32[1,128], index: 4, kind: input, shape index: {}]   ;;  %s1383_s5 = inlined_call_operand.vmem [shape: f32[1,128], index: 5, kind: input, shape index: {}]   ;;  %s1384_s6 = inlined_call_operand.<no memory space> [shape: f32[1,1], index: 6, kind: input, shape index: {}]   ;;  %s1385_s7 = inlined_call_operand.vmem [shape: f32[256,1], index: 7, kind: output, shape index: {}]  }
   0x1   :  { %v12_v0 = vstv %s1384_s6 }
   0x2   :  { %13 = vst [vmem:[#allocation2] sm:$0x1] %v12_v0 }
   0x3   :  { %14 = vsyncpa [#allocation4], 0 }
   0x4   :  { %16 = vsyncpa [#allocation4 + $0x1], 0 }
   0x5   :  { %17 = vsyncpa [#allocation6], 0  ;;  %s1172_s26 = smov 0   ;;  %s1174_s27 = smov 0  }
   0x6   :  { %s1176_s28 = smov 0   ;;  %s1178_s29 = smov 0  }
   0x7 LB: > { %s811_s6 = sadd.s32 4294967295, %s1121_s29   ;;  %p43_p0 = scmp.ne.s32.totalorder %s1113_s27, %s1109_s26  ;;  %s1121_s29 = sphi %s1178_s29, %s1394_s29   ;;  %s1117_s28 = sphi %s1176_s28, %s1393_s28   ;;  %s1113_s27 = sphi %s1174_s27, %s1392_s27   ;;  %s1109_s26 = sphi %s1172_s26, %s1391_s26  }
   0x8   : > { %p1194_p1 = scmp.eq.s32.totalorder %s811_s6, 0  ;;  %p813_p2 = scmp.ge.s32.totalorder %s1121_s29, 1 }
   0x9   : > { %p206_p3 = scmp.lt.s32.totalorder %s1121_s29, 3  ;;  %s217_s11 = sshll.u32 %s1379_s1, 4  ;;  %s218_s11 = int_to_ptr.hbm [resolvable:$true] %s217_s11 }
   0xa   : > { %p1202_p4 = por %p1194_p1, %p43_p0  ;;  %s1123_s13 = smov [#allocation5]  }
   0xb   : > { %p1209_p5 = pnand %p813_p2, %p206_p3  ;;  %s219_s14 = sshll.u32 %s1123_s13, 4  ;;  %s220_s14 = int_to_ptr.vmem [resolvable:$true] %s219_s14 }
   0xc   : > { %s234_s17 = sshll.u32 %s1381_s3, 4  ;;  %s1124_s18 = smov 64   ;;  %s235_s17 = int_to_ptr.hbm [resolvable:$true] %s234_s17 }
   0xd   : > { %p935_p6 = pneg %p1209_p5  ;;  %s1125_s19 = smov 4  }
   0xe   : > { %s1126_s20 = smov [#allocation7]   ;;  %s1221_s22 = sadd.s32 1, %s1121_s29  }
   0xf   : > { %p936_p7 = pnand %p935_p6, %p1194_p1  ;;  %s236_s21 = sshll.u32 %s1126_s20, 4  ;;  %s237_s21 = int_to_ptr.vmem [resolvable:$true] %s236_s21 }
  0x10   : > { %s30_s23 = sadd.s32 1, %s1117_s28  ;;  %s27_s24 = ssub.s32 %s1121_s29, %s1221_s22 }
  0x11   : > { %938 = dma.hbm_to_vmem [thread:$0]  (!%p936_p7), %s218_s11, 1024, %s220_s14, [#allocation6], %s1124_s18, %s1124_s18, %s1125_s19  }
  0x12   : > { %941 = dma.hbm_to_vmem [thread:$0]  (!%p936_p7), %s235_s17, 1024, %s237_s21, [#allocation6], %s1124_s18, %s1124_s18, %s1125_s19  }
  0x13   : > { %p37_p8 = scmp.ne.s32.totalorder %s1117_s28, %s1113_s27  ;;  %p28_p9 = scmp.eq.s32.totalorder %s27_s24, 0 }
  0x14   : > { %p38_p10 = scmp.eq.s32.totalorder %s1121_s29, 0  ;;  %p948_p11 = scmp.lt.s32.totalorder %s1121_s29, 2 }
  0x15   : > { %s259_s25 = sand.u32 1, %s1117_s28   ;;  %s892_s10 = sshll.u32 %s1121_s29, 7 }
  0x16   : > { %s1232_s26 = scalar_select %p28_p9, %s1117_s28, %s30_s23  }
  0x17   : > { %p39_p12 = por %p38_p10, %p37_p8  ;;  %s817_s9 = sshll.u32 %s259_s25, 7 }
  0x18   : > { %s268_s14 = scalar_lea.hbm %s1378_s0, %s892_s10  ;;  %s263_s16 = scalar_lea.vmem [#allocation3], %s817_s9 }
  0x19   : > { %s269_s15 = sshll.u32 %s268_s14, 4  ;;  %s271_s17 = sshll.u32 %s263_s16, 4  ;;  %s270_s15 = int_to_ptr.hbm [resolvable:$true] %s269_s15  ;;  %s272_s17 = int_to_ptr.vmem [resolvable:$true] %s271_s17 }
  0x1a   : > { %p1238_p13 = pnand %p948_p11, %p39_p12  ;;  %s260_s19 = scalar_lea.sflag [#allocation4], %s259_s25 }
  0x1b   : > { %s1053_s20 = sshra.s32 %s270_s15, 4  ;;  %s1060_s9 = scalar_lea.hbm %s1378_s0, 256  ;;  %s1054_s20 = int_to_ptr.hbm [resolvable:$true] %s1053_s20 }
  0x1c   : > { %s1055_s21 = scalar_lea.hbm %s1054_s20, 128  ;;  %p1057_p2 = pneg %p1238_p13 }
  0x1d   : > { %p1056_p0 = scmp.ne.s32.totalorder %s1054_s20, %s1055_s21  ;;  %p1061_p7 = scmp.lt.s32.totalorder %s1054_s20, %s1378_s0 }
  0x1e   : > { %p1062_p8 = scmp.lt.s32.totalorder %s1060_s9, %s1055_s21 }
  0x1f   : > { %p1058_p3 = pnand %p1057_p2, %p1056_p0 }
  0x20   : > { %p1063_p9 = por %p1062_p8, %p1061_p7 }
  0x21   : > { %p1059_p6 = pneg %p1058_p3 }
  0x23   : > { %p1064_p10 = pnand %p1063_p9, %p1059_p6 }
  0x25   : > { %1067 = shalt.err (!%p1064_p10)
}
  0x26   : > { %s1127_s25 = smov 128   ;;  %s1128_s13 = smov 8  }
  0x27   : > { %945 = dma.hbm_to_vmem [thread:$0]  (!%p1238_p13), %s270_s15, 2048, %s272_s17, %s260_s19, %s1127_s25, %s1127_s25, %s1128_s13  }
  0x28   : > { %283 = sbr.rel (%p1209_p5) target bundleno = 539 (0x21b), region = 48  ;;  %s285_s14 = sand.u32 (!%p1209_p5), 1, %s1113_s27  }
  0x29   : > { %s821_s16 = sshll.u32 (!%p1209_p5), %s285_s14, 7  ;;  %s286_s23 = scalar_lea.sflag (!%p1209_p5), [#allocation4], %s285_s14 }
  0x2a   : > { %s1255_s24 = scalar_lea.vmem (!%p1209_p5), [#allocation3], %s821_s16 }
  0x2d   : > { %1100 = dma.done.wait (%p1202_p4), %s286_s23, 2048  }
  0x2e   : > { %1102 = vsyncadd (%p1202_p4), %s286_s23, 4294965248 }
  0x2f   : > { %1104 = dma.done.wait (%p1194_p1), [#allocation6], 2048  }
  0x30   : > { %1106 = vsyncadd (%p1194_p1), [#allocation6], 4294965248  ;;  %v900_v1 = vld [vmem:[#allocation5 + $0x38] sm:$0xff]  ;;  %v899_v2 = vld [vmem:[#allocation5 + $0x30] sm:$0xff]  ;;  %s824_s19 = sshll.u32 %s811_s6, 4  ;;  %vm708_vm0 = vcmask 7168  }
  0x31   : > { %430 = vmatpush.bf16.msra.mxu0 %v900_v1  ;;  %909 = vmatpush.bf16.msra.mxu2 %v900_v1  ;;  %v898_v3 = vld [vmem:[#allocation5 + $0x28] sm:$0xff]  ;;  %v897_v4 = vld [vmem:[#allocation5 + $0x20] sm:$0xff]  ;;  %v896_v5 = vld [vmem:[#allocation5 + $0x18] sm:$0xff]  ;;  %p333_p1 = scmp.lt.s32.totalorder %s824_s19, 31 }
  0x32   : > { %v895_v6 = vld [vmem:[#allocation5 + $0x10] sm:$0xff]  ;;  %v894_v7 = vld [vmem:[#allocation5 + $0x8] sm:$0xff]  ;;  %v893_v8 = vld [vmem:[#allocation5] sm:$0xff] }
  0x33   : > { %v338_v9 = vld [vmem:[%s1255_s24] sm:$0xff]  ;;  %v339_v10 = vld [vmem:[%s1255_s24 + $0x8] sm:$0xff]  ;;  %v340_v15 = vld [vmem:[%s1255_s24 + $0x10] sm:$0xff]  ;;  %s1396_s19 = smov (!%p333_p1, %s824_s19), 31 }
  0x34   : > { %v346_v11 = vld [vmem:[%s1255_s24 + $0x40] sm:$0xff]  ;;  %v347_v12 = vld [vmem:[%s1255_s24 + $0x48] sm:$0xff]  ;;  %v354_v13 = vpack.c.bf16 %v339_v10, %v338_v9  ;;  %v341_v16 = vld [vmem:[%s1255_s24 + $0x18] sm:$0xff]  ;;  %s825_s20 = sshll.u32 %s1396_s19, 3 }
  0x35   : > { %431 = vmatpush.bf16.msra.mxu0 %v899_v2  ;;  %910 = vmatpush.bf16.msra.mxu2 %v899_v2  ;;  %v358_v14 = vpack.c.bf16 %v347_v12, %v346_v11  ;;  %v348_v17 = vld [vmem:[%s1255_s24 + $0x50] sm:$0xff]  ;;  %v349_v18 = vld [vmem:[%s1255_s24 + $0x58] sm:$0xff]  ;;  %v355_v19 = vpack.c.bf16 %v341_v16, %v340_v15  ;;  %v906_v23 = vld [vmem:[#allocation7 + $0x28] sm:$0xff]  ;;  %s1331_s10 = scalar_lea.vmem %s1385_s7, %s825_s20 }
  0x36   : > { %v359_v20 = vpack.c.bf16 %v349_v18, %v348_v17  ;;  %v908_v21 = vld [vmem:[#allocation7 + $0x38] sm:$0xff]  ;;  %v907_v22 = vld [vmem:[#allocation7 + $0x30] sm:$0xff]  ;;  %v342_v24 = vld [vmem:[%s1255_s24 + $0x20] sm:$0xff] }
  0x37   : > { %571 = vmatpush.bf16.msra.mxu1 %v908_v21  ;;  %917 = vmatpush.bf16.msra.mxu3 %v908_v21  ;;  %v343_v25 = vld [vmem:[%s1255_s24 + $0x28] sm:$0xff]  ;;  %v350_v26 = vld [vmem:[%s1255_s24 + $0x60] sm:$0xff]  ;;  %v344_v31 = vld [vmem:[%s1255_s24 + $0x30] sm:$0xff] }
  0x38   : > { %v351_v27 = vld [vmem:[%s1255_s24 + $0x68] sm:$0xff]  ;;  %v905_v28 = vld [vmem:[#allocation7 + $0x20] sm:$0xff]  ;;  %v356_v29 = vpack.c.bf16 %v343_v25, %v342_v24  ;;  %v345_v32 = vld [vmem:[%s1255_s24 + $0x38] sm:$0xff] }
  0x39   : > { %432 = vmatpush.bf16.msra.mxu0 %v898_v3  ;;  %911 = vmatpush.bf16.msra.mxu2 %v898_v3  ;;  %v360_v30 = vpack.c.bf16 %v351_v27, %v350_v26  ;;  %v352_v33 = vld [vmem:[%s1255_s24 + $0x70] sm:$0xff]  ;;  %v353_v34 = vld [vmem:[%s1255_s24 + $0x78] sm:$0xff]  ;;  %v357_v35 = vpack.c.bf16 %v345_v32, %v344_v31  ;;  %v902_v39 = vld [vmem:[#allocation7 + $0x8] sm:$0xff] }
  0x3a   : > { %v361_v36 = vpack.c.bf16 %v353_v34, %v352_v33  ;;  %v904_v37 = vld [vmem:[#allocation7 + $0x18] sm:$0xff]  ;;  %v903_v38 = vld [vmem:[#allocation7 + $0x10] sm:$0xff]  ;;  %v901_v40 = vld [vmem:[#allocation7] sm:$0xff] }
  0x3b   : > { %572 = vmatpush.bf16.msra.mxu1 %v907_v22  ;;  %918 = vmatpush.bf16.msra.mxu3 %v907_v22  ;;  %v989_v42 = vld [vmem:[%s1380_s2] ss:$0 sm:$0xff] }
  0x3c   : > { %v1287_v34 = vld [vmem:[%s1382_s4] ss:$0 sm:$0xff] }
  0x3d   : > { %433 = vmatpush.bf16.msra.mxu0 %v897_v4  ;;  %912 = vmatpush.bf16.msra.mxu2 %v897_v4 }
  0x3f   : > { %573 = vmatpush.bf16.msra.mxu1 %v906_v23  ;;  %919 = vmatpush.bf16.msra.mxu3 %v906_v23 }
  0x41   : > { %434 = vmatpush.bf16.msra.mxu0 %v896_v5  ;;  %913 = vmatpush.bf16.msra.mxu2 %v896_v5 }
  0x43   : > { %574 = vmatpush.bf16.msra.mxu1 %v905_v28  ;;  %920 = vmatpush.bf16.msra.mxu3 %v905_v28 }
  0x45   : > { %435 = vmatpush.bf16.msra.mxu0 %v895_v6  ;;  %914 = vmatpush.bf16.msra.mxu2 %v895_v6 }
  0x47   : > { %575 = vmatpush.bf16.msra.mxu1 %v904_v37  ;;  %921 = vmatpush.bf16.msra.mxu3 %v904_v37  ;;  %v1293_v37 = vld [vmem:[%s1383_s5] ss:$0 sm:$0xff] }
  0x49   : > { %436 = vmatpush.bf16.msra.mxu0 %v894_v7  ;;  %915 = vmatpush.bf16.msra.mxu2 %v894_v7 }
  0x4b   : > { %576 = vmatpush.bf16.msra.mxu1 %v903_v38  ;;  %922 = vmatpush.bf16.msra.mxu3 %v903_v38 }
  0x4d   : > { %437 = vmatpush.bf16.msra.mxu0 %v893_v8  ;;  %916 = vmatpush.bf16.msra.mxu2 %v893_v8 }
  0x4f   : > { %577 = vmatpush.bf16.msra.mxu1 %v902_v39  ;;  %923 = vmatpush.bf16.msra.mxu3 %v902_v39 }
  0x50   : > { %438 = vmatmul.bf16.vlgmr.msra.gmra.mxu0 %v354_v13  ;;  %458 = vmatmul.bf16.vlgmr.msra.gmra.mxu2 %v358_v14 }
  0x53   : > { %578 = vmatpush.bf16.msra.mxu1 %v901_v40  ;;  %924 = vmatpush.bf16.msra.mxu3 %v901_v40 }
  0x60   : > { %443 = vmatmul.bf16.gmra.mxu0 %v355_v19  ;;  %463 = vmatmul.bf16.gmra.mxu2 %v359_v20 }
  0x70   : > { %448 = vmatmul.bf16.gmra.mxu0 %v356_v29  ;;  %468 = vmatmul.bf16.gmra.mxu2 %v360_v30 }
  0x80   : > { %453 = vmatmul.bf16.gmra.mxu0 %v357_v35  ;;  %473 = vmatmul.bf16.gmra.mxu2 %v361_v36 }
  0xcd   : > { %v439_v41 = vpop.f32.mrf.mxu0 }
  0xce   : > { %v440_v44 = vadd.f32 %v989_v42, %v439_v41 }
  0xd0   : > { %v479_v47 = vmax.f32 %v440_v44, 0.0 }
  0xd3   : > { %v459_v43 = vpop.f32.mrf.mxu2 }
  0xd4   : > { %v460_v49 = vadd.f32 %v989_v42, %v459_v43 }
  0xd5   : > { %v441_v45 = vpop.f32.mrf.mxu0 }
  0xd6   : > { %v442_v46 = vadd.f32 %v989_v42, %v441_v45  ;;  %v487_v54 = vmax.f32 %v460_v49, 0.0 }
  0xd8   : > { %v480_v48 = vmax.f32 %v442_v46, 0.0 }
  0xda   : > { %v495_v50 = vpack.c.bf16 %v480_v48, %v479_v47 }
  0xdb   : > { %v461_v51 = vpop.f32.mrf.mxu2 }
  0xdc   : > { %v462_v52 = vadd.f32 %v989_v42, %v461_v51  ;;  %579 = vmatmul.bf16.vlgmr.msra.gmra.mxu1 %v495_v50 }
  0xdd   : > { %v444_v53 = vpop.f32.mrf.mxu0 }
  0xde   : > { %v488_v55 = vmax.f32 %v462_v52, 0.0  ;;  %v445_v58 = vadd.f32 %v989_v42, %v444_v53 }
  0xe0   : > { %v499_v56 = vpack.c.bf16 %v488_v55, %v487_v54  ;;  %v481_v61 = vmax.f32 %v445_v58, 0.0 }
  0xe2   : > { %599 = vmatmul.bf16.vlgmr.msra.gmra.mxu3 %v499_v56 }
  0xe3   : > { %v464_v57 = vpop.f32.mrf.mxu2 }
  0xe4   : > { %v465_v63 = vadd.f32 %v989_v42, %v464_v57 }
  0xe5   : > { %v446_v59 = vpop.f32.mrf.mxu0 }
  0xe6   : > { %v447_v60 = vadd.f32 %v989_v42, %v446_v59  ;;  %v489_v4 = vmax.f32 %v465_v63, 0.0 }
  0xe8   : > { %v482_v62 = vmax.f32 %v447_v60, 0.0 }
  0xea   : > { %v496_v0 = vpack.c.bf16 %v482_v62, %v481_v61 }
  0xeb   : > { %v466_v1 = vpop.f32.mrf.mxu2 }
  0xec   : > { %v467_v2 = vadd.f32 %v989_v42, %v466_v1  ;;  %584 = vmatmul.bf16.gmra.mxu1 %v496_v0 }
  0xed   : > { %v449_v3 = vpop.f32.mrf.mxu0 }
  0xee   : > { %v490_v5 = vmax.f32 %v467_v2, 0.0  ;;  %v450_v8 = vadd.f32 %v989_v42, %v449_v3 }
  0xf0   : > { %v500_v6 = vpack.c.bf16 %v490_v5, %v489_v4  ;;  %v483_v11 = vmax.f32 %v450_v8, 0.0 }
  0xf2   : > { %604 = vmatmul.bf16.gmra.mxu3 %v500_v6 }
  0xf3   : > { %v469_v7 = vpop.f32.mrf.mxu2 }
  0xf4   : > { %v470_v13 = vadd.f32 %v989_v42, %v469_v7 }
  0xf5   : > { %v451_v9 = vpop.f32.mrf.mxu0 }
  0xf6   : > { %v452_v10 = vadd.f32 %v989_v42, %v451_v9  ;;  %v491_v18 = vmax.f32 %v470_v13, 0.0 }
  0xf8   : > { %v484_v12 = vmax.f32 %v452_v10, 0.0 }
  0xfa   : > { %v497_v14 = vpack.c.bf16 %v484_v12, %v483_v11 }
  0xfb   : > { %v471_v15 = vpop.f32.mrf.mxu2 }
  0xfc   : > { %v472_v16 = vadd.f32 %v989_v42, %v471_v15  ;;  %589 = vmatmul.bf16.gmra.mxu1 %v497_v14 }
  0xfd   : > { %v454_v17 = vpop.f32.mrf.mxu0 }
  0xfe   : > { %v492_v19 = vmax.f32 %v472_v16, 0.0  ;;  %v455_v22 = vadd.f32 %v989_v42, %v454_v17 }
 0x100   : > { %v501_v20 = vpack.c.bf16 %v492_v19, %v491_v18  ;;  %v485_v25 = vmax.f32 %v455_v22, 0.0 }
 0x102   : > { %609 = vmatmul.bf16.gmra.mxu3 %v501_v20 }
 0x103   : > { %v474_v21 = vpop.f32.mrf.mxu2 }
 0x104   : > { %v475_v27 = vadd.f32 %v989_v42, %v474_v21 }
 0x105   : > { %v456_v23 = vpop.f32.mrf.mxu0 }
 0x106   : > { %v457_v24 = vadd.f32 %v989_v42, %v456_v23  ;;  %v493_v31 = vmax.f32 %v475_v27, 0.0 }
 0x108   : > { %v486_v26 = vmax.f32 %v457_v24, 0.0 }
 0x10a   : > { %v498_v28 = vpack.c.bf16 %v486_v26, %v485_v25 }
 0x10b   : > { %v476_v29 = vpop.f32.mrf.mxu2 }
 0x10c   : > { %v477_v30 = vadd.f32 %v989_v42, %v476_v29  ;;  %594 = vmatmul.bf16.gmra.mxu1 %v498_v28 }
 0x10e   : > { %v494_v32 = vmax.f32 %v477_v30, 0.0 }
 0x110   : > { %v502_v33 = vpack.c.bf16 %v494_v32, %v493_v31 }
 0x112   : > { %614 = vmatmul.bf16.gmra.mxu3 %v502_v33 }
 0x159   : > { %v580_v35 = vpop.f32.mrf.mxu1 }
 0x15a   : > { %v581_v36 = vadd.f32 %v1287_v34, %v580_v35 }
 0x15c   : > { %v620_v38 = vmax.f32 %v581_v36, 0.0 }
 0x15e   : > { %v640_v39 = vmul.f32 %v1293_v37, %v620_v38  ;;  %v992_v38 = vld [vmem:[#allocation2] ss:$0 sm:$0xff] }
 0x160   : > { %656 = vadd.xlane.f32.xlu0 %v640_v39 }
 0x161   : > { %v582_v40 = vpop.f32.mrf.mxu1 }
 0x162   : > { %v583_v41 = vadd.f32 %v1287_v34, %v582_v40 }
 0x164   : > { %v621_v42 = vmax.f32 %v583_v41, 0.0 }
 0x165   : > { %v600_v43 = vpop.f32.mrf.mxu3 }
 0x166   : > { %v601_v44 = vadd.f32 %v1287_v34, %v600_v43  ;;  %v641_v45 = vmul.f32 %v1293_v37, %v621_v42 }
 0x168   : > { %v628_v46 = vmax.f32 %v601_v44, 0.0  ;;  %658 = vadd.xlane.f32.xlu0 %v641_v45 }
 0x169   : > { %v585_v47 = vpop.f32.mrf.mxu1 }
 0x16a   : > { %v586_v48 = vadd.f32 %v1287_v34, %v585_v47  ;;  %v648_v49 = vmul.f32 %v1293_v37, %v628_v46 }
 0x16c   : > { %v622_v50 = vmax.f32 %v586_v48, 0.0  ;;  %672 = vadd.xlane.f32.xlu2 %v648_v49 }
 0x16d   : > { %v602_v51 = vpop.f32.mrf.mxu3 }
 0x16e   : > { %v603_v52 = vadd.f32 %v1287_v34, %v602_v51  ;;  %v642_v53 = vmul.f32 %v1293_v37, %v622_v50 }
 0x170   : > { %v629_v54 = vmax.f32 %v603_v52, 0.0  ;;  %660 = vadd.xlane.f32.xlu1 %v642_v53 }
 0x171   : > { %v587_v55 = vpop.f32.mrf.mxu1 }
 0x172   : > { %v588_v56 = vadd.f32 %v1287_v34, %v587_v55  ;;  %v649_v57 = vmul.f32 %v1293_v37, %v629_v54 }
 0x174   : > { %v623_v58 = vmax.f32 %v588_v56, 0.0  ;;  %674 = vadd.xlane.f32.xlu0 %v649_v57 }
 0x175   : > { %v605_v59 = vpop.f32.mrf.mxu3 }
 0x176   : > { %v606_v60 = vadd.f32 %v1287_v34, %v605_v59  ;;  %v643_v61 = vmul.f32 %v1293_v37, %v623_v58 }
 0x178   : > { %662 = vadd.xlane.f32.xlu1 %v643_v61  ;;  %v630_v63 = vmax.f32 %v606_v60, 0.0 }
 0x179   : > { %v590_v62 = vpop.f32.mrf.mxu1 }
 0x17a   : > { %v591_v0 = vadd.f32 %v1287_v34, %v590_v62  ;;  %v650_v5 = vmul.f32 %v1293_v37, %v630_v63 }
 0x17c   : > { %v624_v1 = vmax.f32 %v591_v0, 0.0 }
 0x17d   : > { %v607_v2 = vpop.f32.mrf.mxu3 }
 0x17e   : > { %v608_v3 = vadd.f32 %v1287_v34, %v607_v2  ;;  %v644_v4 = vmul.f32 %v1293_v37, %v624_v1 }
 0x180   : > { %664 = vadd.xlane.f32.xlu2 %v644_v4  ;;  %676 = vadd.xlane.f32.xlu1 %v650_v5  ;;  %v631_v7 = vmax.f32 %v608_v3, 0.0 }
 0x181   : > { %v592_v6 = vpop.f32.mrf.mxu1 }
 0x182   : > { %v593_v9 = vadd.f32 %v1287_v34, %v592_v6  ;;  %v651_v11 = vmul.f32 %v1293_v37, %v631_v7 }
 0x184   : > { %v625_v14 = vmax.f32 %v593_v9, 0.0 }
 0x185   : > { %v610_v8 = vpop.f32.mrf.mxu3 }
 0x186   : > { %v611_v10 = vadd.f32 %v1287_v34, %v610_v8  ;;  %v645_v19 = vmul.f32 %v1293_v37, %v625_v14 }
 0x188   : > { %v632_v12 = vmax.f32 %v611_v10, 0.0  ;;  %678 = vadd.xlane.f32.xlu2 %v651_v11 }
 0x189   : > { %v595_v13 = vpop.f32.mrf.mxu1 }
 0x18a   : > { %v596_v15 = vadd.f32 %v1287_v34, %v595_v13  ;;  %v652_v16 = vmul.f32 %v1293_v37, %v632_v12 }
 0x18c   : > { %680 = vadd.xlane.f32.xlu0 %v652_v16  ;;  %v626_v18 = vmax.f32 %v596_v15, 0.0 }
 0x18d   : > { %v612_v17 = vpop.f32.mrf.mxu3 }
 0x18e   : > { %v646_v22 = vmul.f32 %v1293_v37, %v626_v18  ;;  %v613_v25 = vadd.f32 %v1287_v34, %v612_v17 }
 0x190   : > { %666 = vadd.xlane.f32.xlu2 %v645_v19  ;;  %v633_v29 = vmax.f32 %v613_v25, 0.0 }
 0x191   : > { %v597_v20 = vpop.f32.mrf.mxu1 }
 0x192   : > { %v598_v21 = vadd.f32 %v1287_v34, %v597_v20  ;;  %v653_v33 = vmul.f32 %v1293_v37, %v633_v29 }
 0x194   : > { %v627_v23 = vmax.f32 %v598_v21, 0.0  ;;  %668 = vadd.xlane.f32.xlu0 %v646_v22 }
 0x195   : > { %v615_v24 = vpop.f32.mrf.mxu3 }
 0x196   : > { %v616_v26 = vadd.f32 %v1287_v34, %v615_v24  ;;  %v647_v27 = vmul.f32 %v1293_v37, %v627_v23 }
 0x198   : > { %v634_v28 = vmax.f32 %v616_v26, 0.0  ;;  %670 = vadd.xlane.f32.xlu1 %v647_v27 }
 0x19a   : > { %v654_v30 = vmul.f32 %v1293_v37, %v634_v28 }
 0x19c   : > { %684 = vadd.xlane.f32.xlu2 %v654_v30 }
 0x19d   : > { %v617_v31 = vpop.f32.mrf.mxu3 }
 0x19e   : > { %v618_v32 = vadd.f32 %v1287_v34, %v617_v31 }
 0x1a0   : > { %v635_v35 = vmax.f32 %v618_v32, 0.0  ;;  %682 = vadd.xlane.f32.xlu1 %v653_v33 }
 0x1a2   : > { %v655_v36 = vmul.f32 %v1293_v37, %v635_v35 }
 0x1a4   : > { %686 = vadd.xlane.f32.xlu0 %v655_v36 }
 0x1d3   : > { %v657_v34 = vpop.xlane.xlu0 %656 }
 0x1d4   : > { %v692_v37 = vadd.f32 %v992_v38, %v657_v34 }
 0x1d6   : > { %709 = vst.msk [vmem:[%s1331_s10] sm:$0xff] %vm708_vm0, %v692_v37 }
 0x1db   : > { %v659_v39 = vpop.xlane.xlu0 %658 }
 0x1dc   : > { %v693_v40 = vadd.f32 %v992_v38, %v659_v39 }
 0x1de   : > { %710 = vst.msk [vmem:[%s1331_s10 + $0x8] sm:$0xff] %vm708_vm0, %v693_v40 }
 0x1df   : > { %v673_v41 = vpop.xlane.xlu2 %672 }
 0x1e0   : > { %v700_v42 = vadd.f32 %v992_v38, %v673_v41 }
 0x1e2   : > { %717 = vst.msk [vmem:[%s1331_s10 + $0x40] sm:$0xff] %vm708_vm0, %v700_v42 }
 0x1e3   : > { %v661_v43 = vpop.xlane.xlu1 %660 }
 0x1e4   : > { %v694_v44 = vadd.f32 %v992_v38, %v661_v43 }
 0x1e6   : > { %711 = vst.msk [vmem:[%s1331_s10 + $0x10] sm:$0xff] %vm708_vm0, %v694_v44 }
 0x1e7   : > { %v675_v45 = vpop.xlane.xlu0 %674 }
 0x1e8   : > { %v701_v46 = vadd.f32 %v992_v38, %v675_v45 }
 0x1ea   : > { %718 = vst.msk [vmem:[%s1331_s10 + $0x48] sm:$0xff] %vm708_vm0, %v701_v46 }
 0x1eb   : > { %v663_v47 = vpop.xlane.xlu1 %662 }
 0x1ec   : > { %v695_v48 = vadd.f32 %v992_v38, %v663_v47 }
 0x1ee   : > { %712 = vst.msk [vmem:[%s1331_s10 + $0x18] sm:$0xff] %vm708_vm0, %v695_v48 }
 0x1f3   : > { %v665_v49 = vpop.xlane.xlu2 %664  ;;  %v677_v50 = vpop.xlane.xlu1 %676 }
 0x1f4   : > { %v696_v51 = vadd.f32 %v992_v38, %v665_v49  ;;  %v702_v52 = vadd.f32 %v992_v38, %v677_v50 }
 0x1f6   : > { %713 = vst.msk [vmem:[%s1331_s10 + $0x20] sm:$0xff] %vm708_vm0, %v696_v51 }
 0x1f7   : > { %719 = vst.msk [vmem:[%s1331_s10 + $0x50] sm:$0xff] %vm708_vm0, %v702_v52 }
 0x1fb   : > { %v679_v53 = vpop.xlane.xlu2 %678 }
 0x1fc   : > { %v703_v54 = vadd.f32 %v992_v38, %v679_v53 }
 0x1fe   : > { %720 = vst.msk [vmem:[%s1331_s10 + $0x58] sm:$0xff] %vm708_vm0, %v703_v54 }
 0x1ff   : > { %v681_v55 = vpop.xlane.xlu0 %680 }
 0x200   : > { %v704_v56 = vadd.f32 %v992_v38, %v681_v55 }
 0x202   : > { %721 = vst.msk [vmem:[%s1331_s10 + $0x60] sm:$0xff] %vm708_vm0, %v704_v56 }
 0x203   : > { %v667_v57 = vpop.xlane.xlu2 %666 }
 0x204   : > { %v697_v58 = vadd.f32 %v992_v38, %v667_v57 }
 0x206   : > { %714 = vst.msk [vmem:[%s1331_s10 + $0x28] sm:$0xff] %vm708_vm0, %v697_v58 }
 0x207   : > { %v669_v59 = vpop.xlane.xlu0 %668 }
 0x208   : > { %v698_v60 = vadd.f32 %v992_v38, %v669_v59 }
 0x20a   : > { %715 = vst.msk [vmem:[%s1331_s10 + $0x30] sm:$0xff] %vm708_vm0, %v698_v60 }
 0x20b   : > { %v671_v61 = vpop.xlane.xlu1 %670 }
 0x20c   : > { %v699_v62 = vadd.f32 %v992_v38, %v671_v61 }
 0x20e   : > { %716 = vst.msk [vmem:[%s1331_s10 + $0x38] sm:$0xff] %vm708_vm0, %v699_v62 }
 0x20f   : > { %v685_v63 = vpop.xlane.xlu2 %684 }
 0x210   : > { %v706_v0 = vadd.f32 %v992_v38, %v685_v63 }
 0x212   : > { %723 = vst.msk [vmem:[%s1331_s10 + $0x70] sm:$0xff] %vm708_vm0, %v706_v0 }
 0x213   : > { %v683_v1 = vpop.xlane.xlu1 %682 }
 0x214   : > { %v705_v2 = vadd.f32 %v992_v38, %v683_v1 }
 0x216   : > { %722 = vst.msk [vmem:[%s1331_s10 + $0x68] sm:$0xff] %vm708_vm0, %v705_v2 }
 0x217   : > { %v687_v3 = vpop.xlane.xlu0 %686 }
 0x218   : > { %v707_v4 = vadd.f32 %v992_v38, %v687_v3 }
 0x21a   : > { %724 = vst.msk [vmem:[%s1331_s10 + $0x78] sm:$0xff] %vm708_vm0, %v707_v4 }
 0x21b PF: > { %s1390_s29 = smov %s1232_s26  ;;  %p20_p4 = scmp.ge.s32.totalorder %s1221_s22, 4  }
 0x21c   : > { %s1391_s26 = smov %s1113_s27  ;;  %s1392_s27 = smov %s1117_s28 }
 0x21d   : > { %s1393_s28 = smov %s1390_s29  ;;  %s1394_s29 = smov %s1221_s22 }
 0x21e   :  { %22 = sbr.rel (!%p20_p4) target bundleno = 7 (0x7), region = 96 }
 0x223   :  { %747 = vsyncpa [#allocation4], 1 }
 0x224   :  { %749 = vsyncpa [#allocation4 + $0x1], 1 }
 0x225   :  { %750 = vsyncpa [#allocation6], 1 }

</bundles_post_ra>
